<compile_context>
chip_gen: v7x
topology: tpu7x:2x2x1
jax: 0.10.0
libtpu: 0.0.40
codegen_flags: <defaults>
</compile_context>

<pallas_src>
import math

import jax
import jax.numpy as jnp
from jax.experimental import pallas as pl
from jax.experimental.pallas import tpu as pltpu


def toy_model_kernel(x_ref, w_ref, b_ref, o_ref):
    # x_ref: (TB, inst, feats)  -- native [batch, inst, feats] layout
    # w_ref: (inst, hidden, feats)
    # b_ref: (inst, feats)
    # o_ref: (TB, inst, feats)
    x = x_ref[...]                       # (TB, inst, feats)
    w = w_ref[...]                       # (inst, hidden, feats)
    b = b_ref[...]                       # (inst, feats)
    d_hidden = w.shape[1]

    # out[b,i,f] = relu( sum_h (sum_f' x[b,i,f'] * W[i,h,f']) * W[i,h,f] + b[i,f] )
    # d_hidden is tiny (2): unroll it.  Each iteration is a VPU broadcast
    # multiply, a lane (XLU) reduction over feats, and a broadcast
    # multiply-accumulate -- no MXU, no weight transpose.
    acc = jnp.zeros_like(x)
    for hd in range(d_hidden):
        w_h = w[:, hd, :]                                              # (inst, feats)
        h_hd = jnp.sum(x * w_h[None, :, :], axis=-1, keepdims=True)    # (TB, inst, 1)
        acc = acc + h_hd * w_h[None, :, :]                             # (TB, inst, feats)

    out = jnp.maximum(acc + b[None, :, :], 0.0)
    o_ref[...] = out.astype(o_ref.dtype)


def _pick_batch_tile(batch: int, target: int = 512) -> int:
    """Largest divisor of `batch` that is <= target while (when possible)
    leaving a grid of >= 2 steps so v7x's two TensorCores both get work."""
    if batch <= 1:
        return max(batch, 1)
    upper = max(1, min(batch // 2, target))
    for tb in range(upper, 0, -1):
        if batch % tb == 0:
            return tb
    return batch


def toy_model_forward(features, W, b_final):
    """features: [batch, inst, feats]; W: [inst, hidden, feats]; b_final: [inst, feats]."""
    batch, n_inst, n_feats = features.shape
    w_inst, d_hidden, w_feats = W.shape
    assert (w_inst, w_feats) == (n_inst, n_feats)

    tb = _pick_batch_tile(batch)
    grid = (batch // tb,)

    return pl.pallas_call(
        toy_model_kernel,
        out_shape=jax.ShapeDtypeStruct((batch, n_inst, n_feats), features.dtype),
        grid=grid,
        in_specs=[
            # batch-tiled activations, instance/feature axes kept whole
            pl.BlockSpec((tb, n_inst, n_feats), lambda i: (i, 0, 0)),
            # weights / bias: full tensors, same block every step
            pl.BlockSpec((n_inst, d_hidden, n_feats), lambda i: (0, 0, 0)),
            pl.BlockSpec((n_inst, n_feats), lambda i: (0, 0)),
        ],
        out_specs=pl.BlockSpec((tb, n_inst, n_feats), lambda i: (i, 0, 0)),
        compiler_params=pltpu.CompilerParams(
            dimension_semantics=("parallel",)),
    )(features, W, b_final)


def reference_forward(features, W, b_final):
    h = jnp.einsum("bif,ihf->bih", features, W)
    out = jnp.einsum("bih,ihf->bif", h, W)
    return jnp.maximum(out + b_final[None, :, :], 0.0)


if __name__ == "__main__":
    # Small, forward-implied shapes.
    batch = 8
    n_inst = 4
    n_features = 5
    d_hidden = 2
    feature_probability = 0.5  # denser than default 0.01 so the test batch isn't all-zero

    key = jax.random.PRNGKey(0)
    k_w, k_mag, k_seed = jax.random.split(key, 3)

    # Deterministic parameter init (xavier_normal_ equivalent for W; zeros for b_final).
    xavier_std = math.sqrt(2.0 / (d_hidden + n_features))
    W = xavier_std * jax.random.normal(k_w, (n_inst, d_hidden, n_features), dtype=jnp.float32)
    b_final = jnp.zeros((n_inst, n_features), dtype=jnp.float32)

    # generate_batch equivalent: sparse uniform features.
    feat_mag = jax.random.uniform(k_mag, (batch, n_inst, n_features), dtype=jnp.float32)
    feat_seed = jax.random.uniform(k_seed, (batch, n_inst, n_features), dtype=jnp.float32)
    features = jnp.where(feat_seed <= feature_probability, feat_mag, 0.0)

    out = jax.block_until_ready(toy_model_forward(features, W, b_final))
    ref = jax.block_until_ready(reference_forward(features, W, b_final))

    assert out.shape == (batch, n_inst, n_features)
    assert jnp.allclose(out, ref, atol=1e-5, rtol=1e-5), "Pallas output mismatch vs reference"

    print("KERNEL_OK")
</pallas_src>

<mosaic_0001>
module attributes {stable_mosaic.version = 11 : i64} {
  func.func @toy_model_kernel(%arg0: i32, %arg1: memref<4x4x5xf32, #tpu.memory_space<vmem>>, %arg2: memref<4x2x5xf32, #tpu.memory_space<vmem>>, %arg3: memref<4x5xf32, #tpu.memory_space<vmem>>, %arg4: memref<4x4x5xf32, #tpu.memory_space<vmem>>) attributes {dimension_semantics = [#tpu.dimension_semantics<parallel>], iteration_bounds = array<i64: 2>, scalar_prefetch = 0 : i64, scratch_operands = 0 : i64, tpu.core_type = #tpu.core_type<tc>, window_params = [{transform_indices = @transform_0, window_bounds = array<i64: 4, 4, 5>}, {pipeline_mode = #tpu.pipeline_mode<synchronous>, transform_indices = @transform_1, window_bounds = array<i64: 4, 2, 5>}, {pipeline_mode = #tpu.pipeline_mode<synchronous>, transform_indices = @transform_2, window_bounds = array<i64: 4, 5>}, {transform_indices = @transform_3, window_bounds = array<i64: 4, 4, 5>}]} {
    %c0 = arith.constant 0 : index
    %c0_0 = arith.constant 0 : index
    %c0_1 = arith.constant 0 : index
    %0 = vector.load %arg1[%c0, %c0_0, %c0_1] : memref<4x4x5xf32, #tpu.memory_space<vmem>>, vector<4x4x5xf32>
    %c0_2 = arith.constant 0 : index
    %c0_3 = arith.constant 0 : index
    %c0_4 = arith.constant 0 : index
    %1 = vector.load %arg2[%c0_2, %c0_3, %c0_4] : memref<4x2x5xf32, #tpu.memory_space<vmem>>, vector<4x2x5xf32>
    %c0_5 = arith.constant 0 : index
    %c0_6 = arith.constant 0 : index
    %2 = vector.load %arg3[%c0_5, %c0_6] : memref<4x5xf32, #tpu.memory_space<vmem>>, vector<4x5xf32>
    %cst = arith.constant 0.000000e+00 : f32
    %3 = vector.broadcast %cst : f32 to vector<4x4x5xf32>
    %4 = vector.extract_strided_slice %1 {offsets = [0, 0, 0], sizes = [4, 1, 5], strides = [1, 1, 1]} : vector<4x2x5xf32> to vector<4x1x5xf32>
    %5 = vector.shape_cast %4 : vector<4x1x5xf32> to vector<4x5xf32>
    %6 = vector.shape_cast %5 : vector<4x5xf32> to vector<1x4x5xf32>
    %7 = vector.broadcast %6 : vector<1x4x5xf32> to vector<4x4x5xf32>
    %8 = arith.mulf %0, %7 : vector<4x4x5xf32>
    %cst_7 = arith.constant dense<0.000000e+00> : vector<4x4xf32>
    %9 = vector.multi_reduction <add>, %8, %cst_7 [2] : vector<4x4x5xf32> to vector<4x4xf32>
    %10 = vector.shape_cast %9 : vector<4x4xf32> to vector<4x4x1xf32>
    %11 = vector.shape_cast %5 : vector<4x5xf32> to vector<1x4x5xf32>
    %12 = vector.broadcast %10 : vector<4x4x1xf32> to vector<4x4x5xf32>
    %13 = vector.broadcast %11 : vector<1x4x5xf32> to vector<4x4x5xf32>
    %14 = arith.mulf %12, %13 : vector<4x4x5xf32>
    %15 = arith.addf %3, %14 : vector<4x4x5xf32>
    %16 = vector.extract_strided_slice %1 {offsets = [0, 1, 0], sizes = [4, 1, 5], strides = [1, 1, 1]} : vector<4x2x5xf32> to vector<4x1x5xf32>
    %17 = vector.shape_cast %16 : vector<4x1x5xf32> to vector<4x5xf32>
    %18 = vector.shape_cast %17 : vector<4x5xf32> to vector<1x4x5xf32>
    %19 = vector.broadcast %18 : vector<1x4x5xf32> to vector<4x4x5xf32>
    %20 = arith.mulf %0, %19 : vector<4x4x5xf32>
    %cst_8 = arith.constant dense<0.000000e+00> : vector<4x4xf32>
    %21 = vector.multi_reduction <add>, %20, %cst_8 [2] : vector<4x4x5xf32> to vector<4x4xf32>
    %22 = vector.shape_cast %21 : vector<4x4xf32> to vector<4x4x1xf32>
    %23 = vector.shape_cast %17 : vector<4x5xf32> to vector<1x4x5xf32>
    %24 = vector.broadcast %22 : vector<4x4x1xf32> to vector<4x4x5xf32>
    %25 = vector.broadcast %23 : vector<1x4x5xf32> to vector<4x4x5xf32>
    %26 = arith.mulf %24, %25 : vector<4x4x5xf32>
    %27 = arith.addf %15, %26 : vector<4x4x5xf32>
    %28 = vector.shape_cast %2 : vector<4x5xf32> to vector<1x4x5xf32>
    %29 = vector.broadcast %28 : vector<1x4x5xf32> to vector<4x4x5xf32>
    %30 = arith.addf %27, %29 : vector<4x4x5xf32>
    %cst_9 = arith.constant 0.000000e+00 : f32
    %31 = vector.broadcast %cst_9 : f32 to vector<4x4x5xf32>
    %32 = arith.maximumf %30, %31 : vector<4x4x5xf32>
    %c0_10 = arith.constant 0 : index
    %c0_11 = arith.constant 0 : index
    %c0_12 = arith.constant 0 : index
    %33 = vector.load %arg4[%c0_10, %c0_11, %c0_12] : memref<4x4x5xf32, #tpu.memory_space<vmem>>, vector<4x4x5xf32>
    tpu.vector_store %arg4[%c0_10, %c0_11, %c0_12], %32 {strides = array<i32>} : memref<4x4x5xf32, #tpu.memory_space<vmem>>, vector<4x4x5xf32>,
    return
  }
  func.func @transform_0(%arg0: i32) -> (i32, i32, i32) {
    %c0_i32 = arith.constant 0 : i32
    %c0_i32_0 = arith.constant 0 : i32
    %c0_i32_1 = arith.constant 0 : i32
    return %arg0, %c0_i32, %c0_i32_0 : i32, i32, i32
  }
  func.func @transform_1(%arg0: i32) -> (i32, i32, i32) {
    %c0_i32 = arith.constant 0 : i32
    %c0_i32_0 = arith.constant 0 : i32
    %c0_i32_1 = arith.constant 0 : i32
    %c0_i32_2 = arith.constant 0 : i32
    return %c0_i32, %c0_i32_0, %c0_i32_1 : i32, i32, i32
  }
  func.func @transform_2(%arg0: i32) -> (i32, i32) {
    %c0_i32 = arith.constant 0 : i32
    %c0_i32_0 = arith.constant 0 : i32
    %c0_i32_1 = arith.constant 0 : i32
    return %c0_i32, %c0_i32_0 : i32, i32
  }
  func.func @transform_3(%arg0: i32) -> (i32, i32, i32) {
    %c0_i32 = arith.constant 0 : i32
    %c0_i32_0 = arith.constant 0 : i32
    %c0_i32_1 = arith.constant 0 : i32
    return %arg0, %c0_i32, %c0_i32_0 : i32, i32, i32
  }
}

</mosaic_0001>

<bundles_post_ra>
// kernel: tpu_custom_call.1
= control target key start
LH: loop header
LB: loop body
LE: loop exit
PB: predicated region body
PF: predicated region fallthrough
CT: control target
= control target key end

     0   :  { %s368_s12 = smov 0   ;;  %s421_s0 = inlined_call_operand.vmem [shape: f32[8,4,5], index: 0, kind: input, shape index: {}]   ;;  %s422_s1 = inlined_call_operand.vmem [shape: f32[4,2,5], index: 1, kind: input, shape index: {}]   ;;  %s423_s2 = inlined_call_operand.vmem [shape: f32[4,5], index: 2, kind: input, shape index: {}]   ;;  %s424_s3 = inlined_call_operand.vmem [shape: f32[8,4,5], index: 3, kind: output, shape index: {}]  }
   0x1 LB: > { %s321_s13 = sadd.s32 4294967295, %s346_s12   ;;  %p325_p0 = scmp.ge.s32.totalorder %s346_s12, 1  ;;  %s346_s12 = sphi %s368_s12, %s13_s12  }
   0x2   : > { %p138_p1 = scmp.lt.s32.totalorder %s346_s12, 3 }
   0x4   : > { %p139_p2 = pnand %p325_p0, %p138_p1 }
   0x5   : > { %s326_s14 = sshll.u32 (!%p139_p2), %s321_s13, 2  ;;  %v178_v0 = vld [vmem:[%s422_s1] sm:$0x3] (!%p139_p2)  ;;  %v179_v1 = vld [vmem:[%s422_s1 + $0x2] sm:$0x3] (!%p139_p2)  ;;  %vm188_vm0 = vcmask (!%p139_p2), 1041409  }
   0x6   : > { %142 = sbr.rel (%p139_p2) target bundleno = 183 (0xb7), region = 32  ;;  %p163_p3 = scmp.lt.s32.totalorder (!%p139_p2), %s326_s14, 7  ;;  %v180_v2 = vld [vmem:[%s422_s1 + $0x4] sm:$0x3] (!%p139_p2)  ;;  %v181_v3 = vld [vmem:[%s422_s1 + $0x6] sm:$0x3] (!%p139_p2) }
   0x7   : > { %v187_v4 = vrot.slane (!%p139_p2), %v179_v1, 7  ;;  %v190_v5 = vrot.slane (!%p139_p2), %v180_v2, 6  ;;  %vm191_vm1 = vcmask (!%p139_p2), 1042434   ;;  %v193_v6 = vrot.slane (!%p139_p2), %v181_v3, 5  ;;  %v182_v44 = vld [vmem:[%s423_s2] sm:$0xf] (!%p139_p2) }
   0x8   : > { %vm194_vm2 = vcmask (!%p139_p2), 1043459   ;;  %v222_v8 = vrot.slane (!%p139_p2), %v178_v0, 1  ;;  %v224_v9 = vrot.slane (!%p139_p2), %v180_v2, 7  ;;  %v226_v11 = vrot.slane (!%p139_p2), %v181_v3, 6 }
   0x9   : > { %v189_v7 = vsel (!%p139_p2), %vm188_vm0, %v187_v4, %v178_v0  ;;  %vm201_vm3 = vcmask (!%p139_p2), 35840  }
   0xa   : > { %v192_v10 = vsel (!%p139_p2), %vm191_vm1, %v190_v5, %v189_v7  ;;  %v223_v13 = vsel (!%p139_p2), %vm188_vm0, %v179_v1, %v222_v8 }
   0xb   : > { %v195_v12 = vsel (!%p139_p2), %vm194_vm2, %v193_v6, %v192_v10  ;;  %v225_v14 = vsel (!%p139_p2), %vm191_vm1, %v224_v9, %v223_v13 }
   0xc   : > { %v227_v17 = vsel (!%p139_p2), %vm194_vm2, %v226_v11, %v225_v14 }
   0xd   : > { %s426_s14 = smov (!%p163_p3, %s326_s14), 7 }
   0xe   : > { %s327_s23 = sshll.u32 %s426_s14, 2 }
   0xf   : > { %s166_s26 = scalar_lea.vmem %s421_s0, %s327_s23  ;;  %s172_s4 = scalar_lea.vmem %s424_s3, %s327_s23 }
  0x10   : > { %v175_v15 = vld [vmem:[%s166_s26 + $0x4] sm:$0xf]  ;;  %v174_v16 = vld [vmem:[%s166_s26] sm:$0xf]  ;;  %v176_v22 = vld [vmem:[%s166_s26 + $0x8] sm:$0xf] }
  0x11   : > { %v198_v18 = vmul.f32 %v195_v12, %v175_v15  ;;  %v197_v19 = vmul.f32 %v195_v12, %v174_v16  ;;  %v230_v20 = vmul.f32 %v227_v17, %v175_v15  ;;  %v229_v21 = vmul.f32 %v227_v17, %v174_v16  ;;  %v177_v29 = vld [vmem:[%s166_s26 + $0xc] sm:$0xf] }
  0x12   : > { %v231_v27 = vmul.f32 %v227_v17, %v176_v22  ;;  %v199_v28 = vmul.f32 %v195_v12, %v176_v22  ;;  %v232_v32 = vmul.f32 %v227_v17, %v177_v29  ;;  %v200_v33 = vmul.f32 %v195_v12, %v177_v29 }
  0x13   : > { %v205_v23 = vsel %vm201_vm3, %v198_v18, 0.0  ;;  %v202_v24 = vsel %vm201_vm3, %v197_v19, 0.0  ;;  %v236_v25 = vsel %vm201_vm3, %v230_v20, 0.0  ;;  %v233_v26 = vsel %vm201_vm3, %v229_v21, 0.0 }
  0x14   : > { %206 = vadd.xlane.f32.xlu1 %v205_v23  ;;  %203 = vadd.xlane.f32.xlu0 %v202_v24  ;;  %v239_v30 = vsel %vm201_vm3, %v231_v27, 0.0  ;;  %v208_v31 = vsel %vm201_vm3, %v199_v28, 0.0  ;;  %v242_v34 = vsel %vm201_vm3, %v232_v32, 0.0  ;;  %v211_v35 = vsel %vm201_vm3, %v200_v33, 0.0 }
  0x18   : > { %237 = vadd.xlane.f32.xlu1 %v236_v25  ;;  %234 = vadd.xlane.f32.xlu0 %v233_v26 }
  0x1c   : > { %240 = vadd.xlane.f32.xlu1 %v239_v30  ;;  %209 = vadd.xlane.f32.xlu0 %v208_v31 }
  0x20   : > { %243 = vadd.xlane.f32.xlu1 %v242_v34  ;;  %212 = vadd.xlane.f32.xlu0 %v211_v35 }
  0xa1   : > { %v207_v36 = vpop.xlane.xlu1 %206  ;;  %v204_v37 = vpop.xlane.xlu0 %203 }
  0xa2   : > { %v215_v40 = vmul.f32 %v207_v36, %v195_v12  ;;  %v214_v41 = vmul.f32 %v204_v37, %v195_v12 }
  0xa5   : > { %v238_v38 = vpop.xlane.xlu1 %237  ;;  %v235_v39 = vpop.xlane.xlu0 %234 }
  0xa6   : > { %v246_v42 = vmul.f32 %v238_v38, %v227_v17  ;;  %v245_v43 = vmul.f32 %v235_v39, %v227_v17 }
  0xa8   : > { %v250_v45 = vadd.f32 %v246_v42, %v215_v40  ;;  %v249_v46 = vadd.f32 %v245_v43, %v214_v41 }
  0xa9   : > { %v241_v47 = vpop.xlane.xlu1 %240  ;;  %v210_v48 = vpop.xlane.xlu0 %209 }
  0xaa   : > { %v254_v49 = vadd.f32 %v250_v45, %v182_v44  ;;  %v253_v50 = vadd.f32 %v249_v46, %v182_v44  ;;  %v247_v51 = vmul.f32 %v241_v47, %v227_v17  ;;  %v216_v52 = vmul.f32 %v210_v48, %v195_v12 }
  0xac   : > { %v258_v53 = vmax.f32 %v254_v49, 0.0  ;;  %v257_v54 = vmax.f32 %v253_v50, 0.0  ;;  %v251_v55 = vadd.f32 %v247_v51, %v216_v52 }
  0xad   : > { %v244_v56 = vpop.xlane.xlu1 %243  ;;  %v213_v57 = vpop.xlane.xlu0 %212 }
  0xae   : > { %261 = vst.msk [vmem:[%s172_s4] sm:$0xf] %vm201_vm3, %v257_v54  ;;  %v255_v58 = vadd.f32 %v251_v55, %v182_v44  ;;  %v248_v59 = vmul.f32 %v244_v56, %v227_v17  ;;  %v217_v60 = vmul.f32 %v213_v57, %v195_v12  ;;  %262 = vst.msk [vmem:[%s172_s4 + $0x4] sm:$0xf] %vm201_vm3, %v258_v53 }
  0xb0   : > { %v259_v61 = vmax.f32 %v255_v58, 0.0  ;;  %v252_v62 = vadd.f32 %v248_v59, %v217_v60 }
  0xb2   : > { %263 = vst.msk [vmem:[%s172_s4 + $0x8] sm:$0xf] %vm201_vm3, %v259_v61  ;;  %v256_v63 = vadd.f32 %v252_v62, %v182_v44 }
  0xb4   : > { %v260_v0 = vmax.f32 %v256_v63, 0.0 }
  0xb6   : > { %264 = vst.msk [vmem:[%s172_s4 + $0xc] sm:$0xf] %vm201_vm3, %v260_v0 }
  0xb7 PF: > { %s13_s12 = sadd.s32 1, %s346_s12  }
  0xb8   : > { %p10_p4 = scmp.ge.s32.totalorder %s13_s12, 4  }
  0xba   :  { %12 = sbr.rel (!%p10_p4) target bundleno = 1 (0x1), region = 62 }

</bundles_post_ra>
